<compile_context>
chip_gen: v6e
topology: v6e:2x2x1
jax: 0.10.0
libtpu: 0.0.40
codegen_flags: <defaults>
</compile_context>

<pallas_src>
import math

import jax
import jax.numpy as jnp
from jax.experimental import pallas as pl
from jax.experimental.pallas import tpu as pltpu


def forget_gates_kernel(z_ref, c_ref, s_ref, w_ref, b_ref, out_ref):
    # z_ref:   (TILE_N*K, Cp)   fused [x | h] rows, one row per (node, child) slot
    # c_ref:   (TILE_N*K, Hp)   child cell states, mask already folded in (pad rows = 0)
    # s_ref:   (TILE_N, TILE_N*K) structural 0/1 segment-sum matrix (same for all tiles)
    # w_ref:   (Cp, Hp)         [W_if.T ; W_hf.T], zero padded
    # b_ref:   (1, Hp)          bias, zero padded
    # out_ref: (TILE_N, Hp)
    u = jnp.dot(z_ref[...], w_ref[...], preferred_element_type=jnp.float32) + b_ref[...]
    gated = jax.nn.sigmoid(u) * c_ref[...]                       # (TILE_N*K, Hp), lane-dense
    out_ref[...] = jnp.dot(s_ref[...], gated,                    # K-children reduction on MXU
                           preferred_element_type=jnp.float32).astype(out_ref.dtype)


def _round_up(a, b):
    return ((a + b - 1) // b) * b


def _pad_to(a, shape):
    return jnp.pad(a, [(0, s - d) for s, d in zip(shape, a.shape)])


def forget_gates(x, h_pad, c_pad, mask, W_if, W_hf, b_f, *, tile_n=128):
    """x: (N, D_in); h_pad/c_pad: (N, K, H); mask: (N, K); W_if: (H, D_in);
    W_hf: (H, H); b_f: (H,).  Returns (N, H) float32."""
    N, d_in = x.shape
    _, K, H = h_pad.shape

    Cp = _round_up(d_in + H, 128)          # lane-dense contraction dim
    Hp = _round_up(H, 128)                 # lane-dense hidden / output dim
    TILE_N = min(tile_n, _round_up(N, 8))  # nodes per grid step (multiple of 8)
    Np = _round_up(N, TILE_N)
    grid = pl.cdiv(Np, TILE_N)

    # Fused matmul input: one row per (node, child) slot = [x_node | h_child].
    z = jnp.concatenate([jnp.repeat(x, K, axis=0), h_pad.reshape(N * K, H)], axis=-1)
    z = _pad_to(z, (Np * K, Cp))

    # Data prep: fold the child mask into c so padded child slots are exactly 0
    # (this replaces the in-kernel (N, K, 1) mask broadcast; childless nodes
    # therefore come out exactly zero, matching the PyTorch loop).
    c_m = _pad_to((c_pad * mask[:, :, None]).reshape(N * K, H), (Np * K, Hp))

    # Fused weight: [W_if.T ; W_hf.T], zero padded to (Cp, Hp).
    W_cat = _pad_to(jnp.concatenate([W_if.T, W_hf.T], axis=0), (Cp, Hp))
    b = _pad_to(b_f.reshape(1, H).astype(jnp.float32), (1, Hp))

    # Structural segment-sum matrix: row j picks the K child rows of local node j.
    rows = jnp.arange(TILE_N)[:, None]
    cols = jnp.arange(TILE_N * K)[None, :]
    S = (cols // K == rows).astype(jnp.float32)                  # (TILE_N, TILE_N*K)

    out = pl.pallas_call(
        forget_gates_kernel,
        out_shape=jax.ShapeDtypeStruct((Np, Hp), jnp.float32),
        grid=(grid,),
        in_specs=[
            pl.BlockSpec((TILE_N * K, Cp), lambda i: (i, 0)),    # z      (streams over N)
            pl.BlockSpec((TILE_N * K, Hp), lambda i: (i, 0)),    # c*mask (streams over N)
            pl.BlockSpec((TILE_N, TILE_N * K), lambda i: (0, 0)),  # S     (resident)
            pl.BlockSpec((Cp, Hp), lambda i: (0, 0)),            # W_cat  (resident)
            pl.BlockSpec((1, Hp), lambda i: (0, 0)),             # bias   (resident)
        ],
        out_specs=pl.BlockSpec((TILE_N, Hp), lambda i: (i, 0)),  # lane-dense (Hp=128k) store
        compiler_params=pltpu.CompilerParams(
            dimension_semantics=("parallel",),                   # megacore-shardable on v7x
        ),
    )(z, c_m, S, W_cat, b)

    return out[:N, :H]


def reference(x, h_pad, c_pad, mask, W_if, W_hf, b_f):
    Wx = x @ W_if.T
    Uh = jnp.einsum("nkh,ih->nki", h_pad, W_hf) + b_f
    f = jax.nn.sigmoid(Wx[:, None, :] + Uh)
    return (f * c_pad * mask[:, :, None]).sum(axis=1)


if __name__ == "__main__":
    # Module hyperparameters (small, consistent with __init__):
    hidden_dim = 32                       # H
    vocab_len = 40
    ident_vec_size = 8
    d_in = vocab_len + ident_vec_size     # 48 — input feature dim of x
    N = 8                                 # number of tree nodes
    K = 4                                 # max children per node (padding bound)

    key = jax.random.PRNGKey(0)
    k_wif, k_whf, k_bf, k_x, k_h, k_c = jax.random.split(key, 6)

    # nn.init.uniform_(-k, k), k = 1/sqrt(H)
    k_init = 1.0 / math.sqrt(hidden_dim)
    W_if = jax.random.uniform(k_wif, (hidden_dim, d_in), jnp.float32, -k_init, k_init)
    W_hf = jax.random.uniform(k_whf, (hidden_dim, hidden_dim), jnp.float32, -k_init, k_init)
    b_f = jax.random.uniform(k_bf, (hidden_dim,), jnp.float32, -k_init, k_init)

    # Inputs: node features + padded ragged children (some nodes have 0 children).
    x = jax.random.uniform(k_x, (N, d_in), jnp.float32)
    h_pad = jax.random.normal(k_h, (N, K, hidden_dim), jnp.float32)
    c_pad = jax.random.normal(k_c, (N, K, hidden_dim), jnp.float32)
    child_counts = jnp.array([3, 0, 2, 4, 1, 0, 4, 2], dtype=jnp.int32)
    mask = (jnp.arange(K)[None, :] < child_counts[:, None]).astype(jnp.float32)

    out = forget_gates(x, h_pad, c_pad, mask, W_if, W_hf, b_f)
    out = jax.block_until_ready(out)

    ref = reference(x, h_pad, c_pad, mask, W_if, W_hf, b_f)
    assert out.shape == (N, hidden_dim)
    assert jnp.allclose(out, ref, atol=1e-5, rtol=1e-5), "mismatch vs reference"
    # nodes with no children must return exactly zero (as in the PyTorch loop)
    assert float(jnp.abs(out[1]).max()) == 0.0
    assert float(jnp.abs(out[5]).max()) == 0.0

    print("KERNEL_OK")
</pallas_src>

<mosaic_0001>
module attributes {stable_mosaic.version = 11 : i64} {
  func.func @forget_gates_kernel(%arg0: i32, %arg1: memref<32x128xf32, #tpu.memory_space<vmem>>, %arg2: memref<32x128xf32, #tpu.memory_space<vmem>>, %arg3: memref<8x32xf32, #tpu.memory_space<vmem>>, %arg4: memref<128x128xf32, #tpu.memory_space<vmem>>, %arg5: memref<1x128xf32, #tpu.memory_space<vmem>>, %arg6: memref<8x128xf32, #tpu.memory_space<vmem>>) attributes {dimension_semantics = [#tpu.dimension_semantics<parallel>], iteration_bounds = array<i64: 1>, scalar_prefetch = 0 : i64, scratch_operands = 0 : i64, tpu.core_type = #tpu.core_type<tc>, window_params = [{transform_indices = @transform_0, window_bounds = array<i64: 32, 128>}, {transform_indices = @transform_1, window_bounds = array<i64: 32, 128>}, {pipeline_mode = #tpu.pipeline_mode<synchronous>, transform_indices = @transform_2, window_bounds = array<i64: 8, 32>}, {pipeline_mode = #tpu.pipeline_mode<synchronous>, transform_indices = @transform_3, window_bounds = array<i64: 128, 128>}, {pipeline_mode = #tpu.pipeline_mode<synchronous>, transform_indices = @transform_4, window_bounds = array<i64: 1, 128>}, {transform_indices = @transform_5, window_bounds = array<i64: 8, 128>}]} {
    %c0 = arith.constant 0 : index
    %c0_0 = arith.constant 0 : index
    %0 = vector.load %arg1[%c0, %c0_0] : memref<32x128xf32, #tpu.memory_space<vmem>>, vector<32x128xf32>
    %c0_1 = arith.constant 0 : index
    %c0_2 = arith.constant 0 : index
    %1 = vector.load %arg4[%c0_1, %c0_2] : memref<128x128xf32, #tpu.memory_space<vmem>>, vector<128x128xf32>
    %cst = arith.constant dense<0.000000e+00> : vector<32x128xf32>
    %2 = tpu.matmul %0, %1, %cst {dimension_numbers = #tpu.dot_dimension_numbers<[1], [0], [0], [1], [0, 0, 1, 1], [], []>} : vector<32x128xf32>, vector<128x128xf32>, vector<32x128xf32> -> vector<32x128xf32>
    %c0_3 = arith.constant 0 : index
    %c0_4 = arith.constant 0 : index
    %3 = vector.load %arg5[%c0_3, %c0_4] : memref<1x128xf32, #tpu.memory_space<vmem>>, vector<1x128xf32>
    %4 = vector.broadcast %3 : vector<1x128xf32> to vector<32x128xf32>
    %5 = arith.addf %2, %4 : vector<32x128xf32>
    %6 = arith.negf %5 : vector<32x128xf32>
    %7 = math.exp %6 : vector<32x128xf32>
    %cst_5 = arith.constant 1.000000e+00 : f32
    %8 = vector.broadcast %cst_5 : f32 to vector<32x128xf32>
    %9 = arith.addf %8, %7 : vector<32x128xf32>
    %10 = arith.divf %8, %9 : vector<32x128xf32>
    %c0_6 = arith.constant 0 : index
    %c0_7 = arith.constant 0 : index
    %11 = vector.load %arg2[%c0_6, %c0_7] : memref<32x128xf32, #tpu.memory_space<vmem>>, vector<32x128xf32>
    %12 = arith.mulf %10, %11 : vector<32x128xf32>
    %c0_8 = arith.constant 0 : index
    %c0_9 = arith.constant 0 : index
    %13 = vector.load %arg3[%c0_8, %c0_9] : memref<8x32xf32, #tpu.memory_space<vmem>>, vector<8x32xf32>
    %cst_10 = arith.constant dense<0.000000e+00> : vector<8x128xf32>
    %14 = tpu.matmul %13, %12, %cst_10 {dimension_numbers = #tpu.dot_dimension_numbers<[1], [0], [0], [1], [0, 0, 1, 1], [], []>} : vector<8x32xf32>, vector<32x128xf32>, vector<8x128xf32> -> vector<8x128xf32>
    %c0_11 = arith.constant 0 : index
    %c0_12 = arith.constant 0 : index
    %15 = vector.load %arg6[%c0_11, %c0_12] : memref<8x128xf32, #tpu.memory_space<vmem>>, vector<8x128xf32>
    tpu.vector_store %arg6[%c0_11, %c0_12], %14 {strides = array<i32>} : memref<8x128xf32, #tpu.memory_space<vmem>>, vector<8x128xf32>,
    return
  }
  func.func @transform_0(%arg0: i32) -> (i32, i32) {
    %c0_i32 = arith.constant 0 : i32
    %c0_i32_0 = arith.constant 0 : i32
    return %arg0, %c0_i32 : i32, i32
  }
  func.func @transform_1(%arg0: i32) -> (i32, i32) {
    %c0_i32 = arith.constant 0 : i32
    %c0_i32_0 = arith.constant 0 : i32
    return %arg0, %c0_i32 : i32, i32
  }
  func.func @transform_2(%arg0: i32) -> (i32, i32) {
    %c0_i32 = arith.constant 0 : i32
    %c0_i32_0 = arith.constant 0 : i32
    %c0_i32_1 = arith.constant 0 : i32
    return %c0_i32, %c0_i32_0 : i32, i32
  }
  func.func @transform_3(%arg0: i32) -> (i32, i32) {
    %c0_i32 = arith.constant 0 : i32
    %c0_i32_0 = arith.constant 0 : i32
    %c0_i32_1 = arith.constant 0 : i32
    return %c0_i32, %c0_i32_0 : i32, i32
  }
  func.func @transform_4(%arg0: i32) -> (i32, i32) {
    %c0_i32 = arith.constant 0 : i32
    %c0_i32_0 = arith.constant 0 : i32
    %c0_i32_1 = arith.constant 0 : i32
    return %c0_i32, %c0_i32_0 : i32, i32
  }
  func.func @transform_5(%arg0: i32) -> (i32, i32) {
    %c0_i32 = arith.constant 0 : i32
    %c0_i32_0 = arith.constant 0 : i32
    return %arg0, %c0_i32 : i32, i32
  }
}

</mosaic_0001>

<bundles_post_ra>
// kernel: tpu_custom_call.1
= control target key start
LH: loop header
LB: loop body
LE: loop exit
PB: predicated region body
PF: predicated region fallthrough
CT: control target
= control target key end

     0   :  { %10 = vsyncpa [#allocation3], 0  ;;  %s590_s0 = inlined_call_operand.hbm [shape: f32[32,128], index: 0, kind: input, shape index: {}]   ;;  %s591_s1 = inlined_call_operand.hbm [shape: f32[32,128], index: 1, kind: input, shape index: {}]   ;;  %s592_s2 = inlined_call_operand.hbm [shape: f32[8,32], index: 2, kind: input, shape index: {}]   ;;  %s593_s3 = inlined_call_operand.hbm [shape: f32[128,128], index: 3, kind: input, shape index: {}]   ;;  %s594_s4 = inlined_call_operand.vmem [shape: f32[1,128], index: 4, kind: input, shape index: {}]   ;;  %s595_s5 = inlined_call_operand.hbm [shape: f32[8,128], index: 5, kind: output, shape index: {}]  }
   0x1   :  { %11 = vsyncpa [#allocation6], 0 }
   0x2   :  { %12 = vsyncpa [#allocation9], 0 }
   0x3   :  { %13 = vsyncpa [#allocation4], 0  ;;  %s524_s18 = smov [#allocation5]   ;;  %s525_s20 = smov [#allocation2]  }
   0x4   :  { %s31_s19 = sshll.u32 %s524_s18, 4  ;;  %s19_s21 = sshll.u32 %s525_s20, 4  ;;  %s32_s19 = int_to_ptr.vmem [resolvable:$true] %s31_s19  ;;  %s20_s21 = int_to_ptr.vmem [resolvable:$true] %s19_s21 }
   0x5   :  { %s424_s22 = scalar_lea.vmem %s32_s19, 512  ;;  %p429_p1 = scmp.lt.s32.totalorder %s32_s19, %s32_s19 }
   0x6   :  { %p425_p0 = scmp.ne.s32.totalorder %s32_s19, %s424_s22  ;;  %p430_p2 = scmp.lt.s32.totalorder %s424_s22, %s424_s22 }
   0x8   :  { %p431_p3 = por %p430_p2, %p429_p1 }
   0xa   :  { %p432_p4 = pnand %p431_p3, %p425_p0 }
   0xc   :  { %435 = shalt.err (!%p432_p4)
}
   0xd   :  { %s526_s23 = smov 128   ;;  %s527_s24 = smov 8  }
   0xe   :  { %37 = dma.hbm_to_vmem [thread:$0]  %s591_s1, 512, %s32_s19, [#allocation6], %s526_s23, %s526_s23, %s527_s24  }
   0xf   :  { %s444_s27 = scalar_lea.vmem %s20_s21, 512  ;;  %p449_p6 = scmp.lt.s32.totalorder %s20_s21, %s20_s21 }
  0x10   :  { %p445_p5 = scmp.ne.s32.totalorder %s20_s21, %s444_s27  ;;  %p450_p7 = scmp.lt.s32.totalorder %s444_s27, %s444_s27 }
  0x12   :  { %p451_p8 = por %p450_p7, %p449_p6 }
  0x14   :  { %p452_p9 = pnand %p451_p8, %p445_p5 }
  0x16   :  { %455 = shalt.err (!%p452_p9)
}
  0x17   :  { %25 = dma.hbm_to_vmem [thread:$0]  %s590_s0, 512, %s20_s21, [#allocation3], %s526_s23, %s526_s23, %s527_s24  }
  0x18   :  { %s528_s30 = smov [#allocation7]   ;;  %s529_s7 = smov [#allocation8]  }
  0x19   :  { %s44_s6 = sshll.u32 %s528_s30, 4  ;;  %s53_s8 = sshll.u32 %s529_s7, 4  ;;  %s45_s6 = int_to_ptr.vmem [resolvable:$true] %s44_s6  ;;  %s54_s8 = int_to_ptr.vmem [resolvable:$true] %s53_s8 }
  0x1a   :  { %s464_s1 = scalar_lea.vmem %s45_s6, 128  ;;  %p469_p11 = scmp.lt.s32.totalorder %s45_s6, %s45_s6 }
  0x1b   :  { %p465_p10 = scmp.ne.s32.totalorder %s45_s6, %s464_s1  ;;  %p470_p12 = scmp.lt.s32.totalorder %s464_s1, %s464_s1 }
  0x1d   :  { %p471_p13 = por %p470_p12, %p469_p11 }
  0x1f   :  { %p472_p0 = pnand %p471_p13, %p465_p10 }
  0x21   :  { %475 = shalt.err (!%p472_p0)
}
  0x22   :  { %47 = dma.hbm_to_vmem [thread:$0]  %s592_s2, 128, %s45_s6, [#allocation6]  }
  0x23   :  { %s484_s11 = scalar_lea.vmem %s54_s8, 2048  ;;  %p489_p2 = scmp.lt.s32.totalorder %s54_s8, %s54_s8 }
  0x24   :  { %p485_p1 = scmp.ne.s32.totalorder %s54_s8, %s484_s11  ;;  %p490_p3 = scmp.lt.s32.totalorder %s484_s11, %s484_s11 }
  0x26   :  { %p491_p4 = por %p490_p3, %p489_p2 }
  0x28   :  { %p492_p5 = pnand %p491_p4, %p485_p1 }
  0x2a   :  { %495 = shalt.err (!%p492_p5)
}
  0x2b   :  { %59 = dma.hbm_to_vmem [thread:$0]  %s593_s3, 2048, %s54_s8, [#allocation9], %s526_s23, %s526_s23, %s527_s24  }
  0x2c   :  { %516 = dma.done.wait [#allocation3], 512  }
  0x2d   :  { %517 = vsyncadd [#allocation3], 4294966784 }
  0x2e   :  { %518 = dma.done.wait [#allocation6], 640  }
  0x2f   :  { %519 = vsyncadd [#allocation6], 4294966656 }
  0x30   :  { %520 = dma.done.wait [#allocation9], 2048  }
  0x31   :  { %521 = vsyncadd [#allocation9], 4294965248  ;;  %v93_v0 = vld [vmem:[#allocation8 + $0x78] sm:$0xff]  ;;  %v92_v1 = vld [vmem:[#allocation8 + $0x70] sm:$0xff]  ;;  %v530_v20 = vmov 0.0   ;;  %vm531_vm0 = vmmov 0  }
  0x32   :  { %342 = vmatprep.subr.mxu0 %v93_v0  ;;  %v91_v2 = vld [vmem:[#allocation8 + $0x68] sm:$0xff]  ;;  %v90_v3 = vld [vmem:[#allocation8 + $0x60] sm:$0xff]  ;;  %v74_v4 = vld [vmem:[#allocation2] sm:$0xff]  ;;  %380 = vmatprep.subr.mxu1 %v530_v20  ;;  %vm219_vm1 = vcmask 261120  }
  0x33   :  { %343 = vmatpush3.msra.mxu0 %v93_v0  ;;  %v89_v5 = vld [vmem:[#allocation8 + $0x58] sm:$0xff]  ;;  %374 = vmatprep.mubr.f32.mxu0 %v74_v4  ;;  %v88_v6 = vld [vmem:[#allocation8 + $0x50] sm:$0xff]  ;;  %v87_v7 = vld [vmem:[#allocation8 + $0x48] sm:$0xff] }
  0x34   :  { %344 = vmatprep.subr.mxu0 %v92_v1  ;;  %v86_v8 = vld [vmem:[#allocation8 + $0x40] sm:$0xff]  ;;  %v85_v9 = vld [vmem:[#allocation8 + $0x38] sm:$0xff]  ;;  %v84_v10 = vld [vmem:[#allocation8 + $0x30] sm:$0xff]  ;;  %388 = vmatprep.mubr.msk.f32.mxu1 %vm531_vm0, %v530_v20 }
  0x35   :  { %345 = vmatpush3.msra.mxu0 %v92_v1  ;;  %v83_v11 = vld [vmem:[#allocation8 + $0x28] sm:$0xff]  ;;  %v82_v12 = vld [vmem:[#allocation8 + $0x20] sm:$0xff]  ;;  %v81_v13 = vld [vmem:[#allocation8 + $0x18] sm:$0xff] }
  0x36   :  { %346 = vmatprep.subr.mxu0 %v91_v2  ;;  %v80_v14 = vld [vmem:[#allocation8 + $0x10] sm:$0xff]  ;;  %v79_v15 = vld [vmem:[#allocation8 + $0x8] sm:$0xff]  ;;  %v78_v16 = vld [vmem:[#allocation8] sm:$0xff] }
  0x37   :  { %347 = vmatpush3.msra.mxu0 %v91_v2  ;;  %v75_v17 = vld [vmem:[#allocation2 + $0x8] sm:$0xff]  ;;  %v76_v18 = vld [vmem:[#allocation2 + $0x10] sm:$0xff]  ;;  %v77_v19 = vld [vmem:[#allocation2 + $0x18] sm:$0xff] }
  0x38   :  { %348 = vmatprep.subr.mxu0 %v90_v3  ;;  %v311_v21 = vld [vmem:[%s594_s4] ss:$0 sm:$0xff]  ;;  %v213_v42 = vld [vmem:[#allocation5 + $0x18] sm:$0xff]  ;;  %v212_v44 = vld [vmem:[#allocation5 + $0x10] sm:$0xff]  ;;  %s532_s4 = smov [#allocation10]  }
  0x39   :  { %349 = vmatpush3.msra.mxu0 %v90_v3  ;;  %v211_v48 = vld [vmem:[#allocation5 + $0x8] sm:$0xff]  ;;  %v210_v51 = vld [vmem:[#allocation5] sm:$0xff]  ;;  %s300_s13 = sshll.u32 %s532_s4, 4  ;;  %s301_s13 = int_to_ptr.vmem [resolvable:$true] %s300_s13 }
  0x3a   :  { %350 = vmatprep.subr.mxu0 %v89_v5  ;;  %v218_v54 = vld [vmem:[#allocation7] sm:$0xff]  ;;  %s496_s14 = scalar_lea.vmem %s301_s13, 128  ;;  %p501_p7 = scmp.lt.s32.totalorder %s301_s13, %s301_s13 }
  0x3b   :  { %351 = vmatpush3.msra.mxu0 %v89_v5  ;;  %p497_p6 = scmp.ne.s32.totalorder %s301_s13, %s496_s14  ;;  %p502_p8 = scmp.lt.s32.totalorder %s496_s14, %s496_s14 }
  0x3c   :  { %352 = vmatprep.subr.mxu0 %v88_v6 }
  0x3d   :  { %353 = vmatpush3.msra.mxu0 %v88_v6  ;;  %p503_p9 = por %p502_p8, %p501_p7 }
  0x3e   :  { %354 = vmatprep.subr.mxu0 %v87_v7 }
  0x3f   :  { %355 = vmatpush3.msra.mxu0 %v87_v7  ;;  %p504_p10 = pnand %p503_p9, %p497_p6 }
  0x40   :  { %356 = vmatprep.subr.mxu0 %v86_v8 }
  0x41   :  { %357 = vmatpush3.msra.mxu0 %v86_v8 }
  0x42   :  { %358 = vmatprep.subr.mxu0 %v85_v9 }
  0x43   :  { %359 = vmatpush3.msra.mxu0 %v85_v9 }
  0x44   :  { %360 = vmatprep.subr.mxu0 %v84_v10 }
  0x45   :  { %361 = vmatpush3.msra.mxu0 %v84_v10 }
  0x46   :  { %362 = vmatprep.subr.mxu0 %v83_v11 }
  0x47   :  { %363 = vmatpush3.msra.mxu0 %v83_v11 }
  0x48   :  { %364 = vmatprep.subr.mxu0 %v82_v12 }
  0x49   :  { %365 = vmatpush3.msra.mxu0 %v82_v12 }
  0x4a   :  { %366 = vmatprep.subr.mxu0 %v81_v13 }
  0x4b   :  { %367 = vmatpush3.msra.mxu0 %v81_v13 }
  0x4c   :  { %368 = vmatprep.subr.mxu0 %v80_v14 }
  0x4d   :  { %369 = vmatpush3.msra.mxu0 %v80_v14 }
  0x4e   :  { %370 = vmatprep.subr.mxu0 %v79_v15 }
  0x4f   :  { %371 = vmatpush3.msra.mxu0 %v79_v15 }
  0x50   :  { %372 = vmatprep.subr.mxu0 %v78_v16 }
  0x51   :  { %373 = vmatpush3.msra.mxu0 %v78_v16 }
  0x52   :  { %375 = vmatmul.mubr.f32.vlgmr.msra.gmra.mxu0 %v75_v17 }
  0x53   :  { %377 = vmatprep.mubr.f32.mxu0 %v76_v18 }
  0x56   :  { %378 = vmatmul.mubr.f32.gmra.mxu0 %v77_v19 }
 0x112   :  { %v376_v22 = vpop.f32.mrf.mxu0 }
 0x113   :  { %v173_v23 = vadd.f32 %v376_v22, %v311_v21 }
 0x114   :  { %v167_v24 = vpop.f32.mrf.mxu0 }
 0x115   :  { %v313_v25 = vmul.f32 -1.442695, %v173_v23  ;;  %v168_v26 = vadd.f32 %v311_v21, %v167_v24 }
 0x116   :  { %v379_v27 = vpop.f32.mrf.mxu0 }
 0x117   :  { %v312_v28 = vmul.f32 -1.442695, %v168_v26  ;;  %v183_v29 = vadd.f32 %v379_v27, %v311_v21  ;;  %400 = vpow2.f32 %v313_v25 }
 0x118   :  { %v177_v30 = vpop.f32.mrf.mxu0 }
 0x119   :  { %v315_v31 = vmul.f32 -1.442695, %v183_v29  ;;  %v178_v32 = vadd.f32 %v311_v21, %v177_v30  ;;  %402 = vpow2.f32 %v312_v28 }
 0x11b   :  { %404 = vpow2.f32 %v315_v31  ;;  %v314_v33 = vmul.f32 -1.442695, %v178_v32 }
 0x11d   :  { %406 = vpow2.f32 %v314_v33 }
 0x124   :  { %v401_v34 = vpop.eup %400 }
 0x125   :  { %v199_v37 = vadd.f32 1.0, %v401_v34 }
 0x126   :  { %v403_v35 = vpop.eup %402 }
 0x127   :  { %v198_v40 = vadd.f32 1.0, %v403_v35 }
 0x128   :  { %v405_v36 = vpop.eup %404 }
 0x129   :  { %v201_v38 = vadd.f32 1.0, %v405_v36 }
 0x12a   :  { %v407_v39 = vpop.eup %406 }
 0x12b   :  { %408 = vrcp.f32 %v201_v38  ;;  %v200_v41 = vadd.f32 1.0, %v407_v39 }
 0x12c   :  { %410 = vrcp.f32 %v199_v37 }
 0x12d   :  { %412 = vrcp.f32 %v200_v41 }
 0x12e   :  { %414 = vrcp.f32 %v198_v40 }
 0x138   :  { %v409_v43 = vpop.eup %408 }
 0x139   :  { %v411_v45 = vpop.eup %410  ;;  %v217_v46 = vmul.f32 %v409_v43, %v213_v42 }
 0x13a   :  { %v413_v47 = vpop.eup %412  ;;  %v215_v52 = vmul.f32 %v411_v45, %v211_v48 }
 0x13b   :  { %381 = vmatpush3.msra.mxu1 %v217_v46  ;;  %v216_v49 = vmul.f32 %v413_v47, %v212_v44  ;;  %v415_v50 = vpop.eup %414 }
 0x13c   :  { %382 = vmatprep.subr.mxu1 %v530_v20  ;;  %v214_v53 = vmul.f32 %v415_v50, %v210_v51 }
 0x13d   :  { %383 = vmatpush3.msra.mxu1 %v216_v49 }
 0x13e   :  { %384 = vmatprep.subr.mxu1 %v530_v20 }
 0x13f   :  { %385 = vmatpush3.msra.mxu1 %v215_v52 }
 0x140   :  { %386 = vmatprep.subr.mxu1 %v530_v20 }
 0x141   :  { %387 = vmatpush3.msra.mxu1 %v214_v53 }
 0x142   :  { %389 = vmatmul.mubr.msk.f32.vlgmr.msra.gmra.mxu1 %vm219_vm1, %v218_v54 }
 0x202   :  { %v289_v55 = vpop.f32.mrf.mxu1 }
 0x203   :  { %293 = vst [vmem:[#allocation10] sm:$0xff] %v289_v55 }
 0x204   :  { %v390_v56 = vpop.f32.mrf.mxu1 }
 0x205   :  { %507 = shalt.err (!%p504_p10)
}
 0x206   :  { %303 = dma.vmem_to_hbm [thread:$0]  %s301_s13, 128, %s595_s5, [#allocation4]  }
 0x207   :  { %522 = dma.done.wait [#allocation4], 128  }
 0x208   :  { %523 = vsyncadd [#allocation4], 4294967168 }
 0x209   :  { %307 = vsyncpa [#allocation3], 1 }
 0x20a   :  { %308 = vsyncpa [#allocation6], 1 }
 0x20b   :  { %309 = vsyncpa [#allocation9], 1 }
 0x20c   :  { %310 = vsyncpa [#allocation4], 1 }

</bundles_post_ra>
